<compile_context>
chip_gen: v5e
topology: v5e:2x2
jax: 0.10.0
libtpu: 0.0.40
codegen_flags: <defaults>
</compile_context>

<pallas_src>
import jax
import jax.numpy as jnp
from jax.experimental import pallas as pl
from jax.experimental.pallas import tpu as pltpu

# ---- config (small shapes consistent with the forward pass) ----
B = 2                                  # batch
C = 3                                  # image channels (NCHW input like PyTorch)
IMG = 16                               # spatial size
PATCH = 8
NPATCH = (IMG // PATCH) ** 2           # 4 patches per image
PDIM = C * PATCH * PATCH               # 192 = flattened patch dim
D = 32                                 # embed dim == encoder.feat_dim
T = NPATCH + 1                         # tokens incl. cls = 5
BT = B * T                             # all tokens of the batch = 10
NHEAD = 2
DH = D // NHEAD
HID = 2 * D                            # MLP hidden = 64
NWAY = 5                               # n_way
HEAD_PAD = 128                         # lane-dense padded head output width
LN_EPS = 1e-5

# packed weight slab (D, WMAT_W) lane offsets: [w_qkv | w_proj | w_head | w_fc1]
QKV_OFF = 0                            # lanes [0, 96)
PROJ_OFF = 3 * D                       # lanes [96, 128)
HEAD_OFF = 4 * D                       # lanes [128, 256)   (128-aligned)
FC1_OFF = 4 * D + HEAD_PAD             # lanes [256, 320)
WMAT_W = FC1_OFF + HID                 # 320

# packed vector slab (VROWS, HEAD_PAD) row layout
R_ADD = 0                              # rows [0, BT): token-assembly add term
R_LN1G = BT
R_LN1B = BT + 1
R_BQKV = BT + 2
R_BPROJ = BT + 3
R_LN2G = BT + 4
R_LN2B = BT + 5
R_BFC1 = BT + 6
R_BFC2 = BT + 7
R_LNFG = BT + 8
R_LNFB = BT + 9
R_BHEAD = BT + 10
VROWS = BT + 11                        # 21


def _layernorm(v, g, b):
    m = jnp.mean(v, axis=-1, keepdims=True)
    var = jnp.mean((v - m) ** 2, axis=-1, keepdims=True)
    return (v - m) * jax.lax.rsqrt(var + LN_EPS) * g + b


def vit_fused_kernel(patches_ref, w_pe_ref, w_mat_ref, w_fc2_ref, vecs_ref,
                     out_ref):
    # ---- static views into the packed parameter slabs (5 total input DMAs) ----
    add_term = vecs_ref[0:BT, 0:D]                      # pos (+cls / +b_pe)
    ln1_g = vecs_ref[R_LN1G:R_LN1G + 1, 0:D]
    ln1_b = vecs_ref[R_LN1B:R_LN1B + 1, 0:D]
    b_qkv = vecs_ref[R_BQKV:R_BQKV + 1, 0:3 * D]
    b_proj = vecs_ref[R_BPROJ:R_BPROJ + 1, 0:D]
    ln2_g = vecs_ref[R_LN2G:R_LN2G + 1, 0:D]
    ln2_b = vecs_ref[R_LN2B:R_LN2B + 1, 0:D]
    b_fc1 = vecs_ref[R_BFC1:R_BFC1 + 1, 0:HID]
    b_fc2 = vecs_ref[R_BFC2:R_BFC2 + 1, 0:D]
    lnf_g = vecs_ref[R_LNFG:R_LNFG + 1, 0:D]
    lnf_b = vecs_ref[R_LNFB:R_LNFB + 1, 0:D]
    b_head = vecs_ref[R_BHEAD:R_BHEAD + 1, :]           # (1, HEAD_PAD)

    w_qkv = w_mat_ref[:, QKV_OFF:QKV_OFF + 3 * D]
    w_proj = w_mat_ref[:, PROJ_OFF:PROJ_OFF + D]
    w_head = w_mat_ref[:, HEAD_OFF:HEAD_OFF + HEAD_PAD]
    w_fc1 = w_mat_ref[:, FC1_OFF:FC1_OFF + HID]

    # ---- patch_embed + token assembly: ONE matmul + ONE add ----
    # pos_drop is forced to eval() by `net.train` -> identity.
    # patches has zero rows at cls positions; add_term carries pos (+cls on cls
    # rows, +b_pe on patch rows) so no sublane concatenation is needed.
    x = jnp.dot(patches_ref[...], w_pe_ref[...],
                preferred_element_type=jnp.float32) + add_term       # (BT, D)

    # ---- block-diagonal additive attention mask, generated in-kernel ----
    rid = jax.lax.broadcasted_iota(jnp.int32, (BT, BT), 0)
    cid = jax.lax.broadcasted_iota(jnp.int32, (BT, BT), 1)
    same = None
    for b in range(B):                                   # static, B=2
        rb = (rid >= b * T) & (rid < (b + 1) * T)
        cb = (cid >= b * T) & (cid < (b + 1) * T)
        same = (rb & cb) if same is None else (same | (rb & cb))
    neg_mask = jnp.where(same, jnp.float32(0.0), jnp.float32(-1e30))

    # per-head lane masks, hoisted out of the head loop
    lane = jax.lax.broadcasted_iota(jnp.int32, (1, D), 1)
    head_masks = [((lane >= hh * DH) & (lane < (hh + 1) * DH)).astype(jnp.float32)
                  for hh in range(NHEAD)]

    # ---- pre-LN MHSA; 1/sqrt(DH) already folded into q cols of w_qkv/b_qkv ----
    h = _layernorm(x, ln1_g, ln1_b)
    qkv = jnp.dot(h, w_qkv, preferred_element_type=jnp.float32) + b_qkv  # (BT, 3D)
    q = qkv[:, 0:D]
    k = qkv[:, D:2 * D]
    v = qkv[:, 2 * D:3 * D]
    k_t = jnp.transpose(k)                               # hoisted, shared by heads

    # Masking q to head h's lanes makes q_h . k == q_h . k_h, and masking the
    # per-head output before summing reproduces the head concatenation.
    attn_out = jnp.zeros((BT, D), jnp.float32)
    for hh in range(NHEAD):                              # static, NHEAD=2
        sc = jnp.dot(q * head_masks[hh], k_t,
                     preferred_element_type=jnp.float32) + neg_mask     # (BT, BT)
        sc = sc - jnp.max(sc, axis=-1, keepdims=True)
        e = jnp.exp(sc)
        p = e * pl.reciprocal(jnp.sum(e, axis=-1, keepdims=True), approx=True)
        attn_out = attn_out + jnp.dot(p, v,
                                      preferred_element_type=jnp.float32) * head_masks[hh]

    x = x + jnp.dot(attn_out, w_proj,
                    preferred_element_type=jnp.float32) + b_proj

    # ---- MLP ----
    h = _layernorm(x, ln2_g, ln2_b)
    h = jnp.dot(h, w_fc1, preferred_element_type=jnp.float32) + b_fc1
    # TODO(synk): PyTorch nn.GELU defaults to exact erf-GELU; tanh approx kept
    # (encoder is an injected module, activation flavor is internal).
    h = jax.nn.gelu(h, approximate=True)
    h = jnp.dot(h, w_fc2_ref[...], preferred_element_type=jnp.float32) + b_fc2
    x = x + h

    # ---- final LN + fused linear head over ALL rows (lane-dense output) ----
    x = _layernorm(x, lnf_g, lnf_b)
    out_ref[...] = jnp.dot(x, w_head,
                           preferred_element_type=jnp.float32) + b_head


def patchify_full(x_nchw):
    # (B, C, H, W) -> (B*T, C*p*p) with ZERO rows at cls positions; patch
    # flatten order (c, ph, pw) matches Conv2d(kernel=stride=patch) flattening.
    xp = x_nchw.reshape(B, C, IMG // PATCH, PATCH, IMG // PATCH, PATCH)
    xp = xp.transpose(0, 2, 4, 1, 3, 5).reshape(B, NPATCH, PDIM)
    zeros = jnp.zeros((B, 1, PDIM), xp.dtype)
    return jnp.concatenate([zeros, xp], axis=1).reshape(BT, PDIM)


@jax.jit
def forward(x_nchw, params):
    patches = patchify_full(x_nchw)            # glue: layout transform only
    vmem = lambda: pl.BlockSpec(memory_space=pltpu.MemorySpace.VMEM)
    out_pad = pl.pallas_call(
        vit_fused_kernel,
        out_shape=jax.ShapeDtypeStruct((BT, HEAD_PAD), jnp.float32),
        in_specs=[vmem() for _ in range(5)],
        out_specs=vmem(),
    )(patches, params['w_pe'], params['w_mat'], params['w_fc2'], params['vecs'])
    # glue: pick the cls rows and drop the lane padding
    return out_pad[::T, :NWAY]                 # (B, NWAY)


def init_params(key):
    ks = jax.random.split(key, 16)
    s = 0.02
    nrm = lambda k, shp: s * jax.random.normal(k, shp, jnp.float32)

    w_conv = nrm(ks[0], (D, C, PATCH, PATCH))
    w_pe = w_conv.reshape(D, PDIM).T                           # (PDIM, D)
    b_pe = nrm(ks[1], (D,))
    cls = nrm(ks[2], (D,))
    pos = nrm(ks[3], (T, D))
    ln1_g = jnp.ones((D,), jnp.float32); ln1_b = jnp.zeros((D,), jnp.float32)
    w_qkv = nrm(ks[4], (D, 3 * D));      b_qkv = nrm(ks[5], (3 * D,))
    w_proj = nrm(ks[6], (D, D));         b_proj = nrm(ks[7], (D,))
    ln2_g = jnp.ones((D,), jnp.float32); ln2_b = jnp.zeros((D,), jnp.float32)
    w_fc1 = nrm(ks[8], (D, HID));        b_fc1 = nrm(ks[9], (HID,))
    w_fc2 = nrm(ks[10], (HID, D));       b_fc2 = nrm(ks[11], (D,))
    lnf_g = jnp.ones((D,), jnp.float32); lnf_b = jnp.zeros((D,), jnp.float32)
    # nn.Linear(feat_dim, n_way): PyTorch layout (n_way, feat_dim)
    w_head = nrm(ks[12], (NWAY, D));     b_head = nrm(ks[13], (NWAY,))

    # fold the 1/sqrt(DH) attention scale into the q columns (free, param time)
    scale = 1.0 / (DH ** 0.5)
    w_qkv = w_qkv.at[:, :D].multiply(scale)
    b_qkv = b_qkv.at[:D].multiply(scale)

    # ---- packed weight slab (D, 320): [w_qkv | w_proj | w_head_pad | w_fc1] ----
    w_head_pad = jnp.zeros((D, HEAD_PAD), jnp.float32).at[:, :NWAY].set(w_head.T)
    w_mat = jnp.zeros((D, WMAT_W), jnp.float32)
    w_mat = w_mat.at[:, QKV_OFF:QKV_OFF + 3 * D].set(w_qkv)
    w_mat = w_mat.at[:, PROJ_OFF:PROJ_OFF + D].set(w_proj)
    w_mat = w_mat.at[:, HEAD_OFF:HEAD_OFF + HEAD_PAD].set(w_head_pad)
    w_mat = w_mat.at[:, FC1_OFF:FC1_OFF + HID].set(w_fc1)

    # ---- token-assembly additive term: pos (+cls on cls rows, +b_pe on patch rows)
    add = jnp.tile(pos, (B, 1))                                # (BT, D)
    is_cls = (jnp.arange(BT) % T) == 0
    add = add + jnp.where(is_cls[:, None], cls[None, :], b_pe[None, :])

    # ---- packed vector slab (VROWS, 128): add term + all bias / LN vectors ----
    vecs = jnp.zeros((VROWS, HEAD_PAD), jnp.float32)
    vecs = vecs.at[0:BT, :D].set(add)
    vecs = vecs.at[R_LN1G, :D].set(ln1_g)
    vecs = vecs.at[R_LN1B, :D].set(ln1_b)
    vecs = vecs.at[R_BQKV, :3 * D].set(b_qkv)
    vecs = vecs.at[R_BPROJ, :D].set(b_proj)
    vecs = vecs.at[R_LN2G, :D].set(ln2_g)
    vecs = vecs.at[R_LN2B, :D].set(ln2_b)
    vecs = vecs.at[R_BFC1, :HID].set(b_fc1)
    vecs = vecs.at[R_BFC2, :D].set(b_fc2)
    vecs = vecs.at[R_LNFG, :D].set(lnf_g)
    vecs = vecs.at[R_LNFB, :D].set(lnf_b)
    vecs = vecs.at[R_BHEAD, :NWAY].set(b_head)

    return {'w_pe': w_pe, 'w_mat': w_mat, 'w_fc2': w_fc2, 'vecs': vecs}


# TODO(synk): reset_protonet_head / reset_r2d2_head (torch.solve) /
# reset_metaoptnet_head (QPFunction) are head re-initializers, not part of
# forward(); not implemented here.

if __name__ == "__main__":
    key = jax.random.PRNGKey(0)
    kx, kp = jax.random.split(key)
    x = jax.random.normal(kx, (B, C, IMG, IMG), jnp.float32)   # NCHW like PyTorch
    params = init_params(kp)

    scores = jax.block_until_ready(forward(x, params))

    assert scores.shape == (B, NWAY) and scores.dtype == jnp.float32
    print("KERNEL_OK")
</pallas_src>

<mosaic_0001>
module attributes {stable_mosaic.version = 11 : i64} {
  func.func @vit_fused_kernel(%arg0: memref<10x192xf32, #tpu.memory_space<vmem>>, %arg1: memref<192x32xf32, #tpu.memory_space<vmem>>, %arg2: memref<32x320xf32, #tpu.memory_space<vmem>>, %arg3: memref<64x32xf32, #tpu.memory_space<vmem>>, %arg4: memref<21x128xf32, #tpu.memory_space<vmem>>, %arg5: memref<10x128xf32, #tpu.memory_space<vmem>>) attributes {dimension_semantics = [], scalar_prefetch = 0 : i64, scratch_operands = 0 : i64, tpu.core_type = #tpu.core_type<tc>} {
    %c0 = arith.constant 0 : index
    %c0_0 = arith.constant 0 : index
    %0 = vector.load %arg4[%c0, %c0_0] : memref<21x128xf32, #tpu.memory_space<vmem>>, vector<10x32xf32>
    %c10 = arith.constant 10 : index
    %c0_1 = arith.constant 0 : index
    %1 = vector.load %arg4[%c10, %c0_1] : memref<21x128xf32, #tpu.memory_space<vmem>>, vector<1x32xf32>
    %c11 = arith.constant 11 : index
    %c0_2 = arith.constant 0 : index
    %2 = vector.load %arg4[%c11, %c0_2] : memref<21x128xf32, #tpu.memory_space<vmem>>, vector<1x32xf32>
    %c12 = arith.constant 12 : index
    %c0_3 = arith.constant 0 : index
    %3 = vector.load %arg4[%c12, %c0_3] : memref<21x128xf32, #tpu.memory_space<vmem>>, vector<1x96xf32>
    %c13 = arith.constant 13 : index
    %c0_4 = arith.constant 0 : index
    %4 = vector.load %arg4[%c13, %c0_4] : memref<21x128xf32, #tpu.memory_space<vmem>>, vector<1x32xf32>
    %c14 = arith.constant 14 : index
    %c0_5 = arith.constant 0 : index
    %5 = vector.load %arg4[%c14, %c0_5] : memref<21x128xf32, #tpu.memory_space<vmem>>, vector<1x32xf32>
    %c15 = arith.constant 15 : index
    %c0_6 = arith.constant 0 : index
    %6 = vector.load %arg4[%c15, %c0_6] : memref<21x128xf32, #tpu.memory_space<vmem>>, vector<1x32xf32>
    %c16 = arith.constant 16 : index
    %c0_7 = arith.constant 0 : index
    %7 = vector.load %arg4[%c16, %c0_7] : memref<21x128xf32, #tpu.memory_space<vmem>>, vector<1x64xf32>
    %c17 = arith.constant 17 : index
    %c0_8 = arith.constant 0 : index
    %8 = vector.load %arg4[%c17, %c0_8] : memref<21x128xf32, #tpu.memory_space<vmem>>, vector<1x32xf32>
    %c18 = arith.constant 18 : index
    %c0_9 = arith.constant 0 : index
    %9 = vector.load %arg4[%c18, %c0_9] : memref<21x128xf32, #tpu.memory_space<vmem>>, vector<1x32xf32>
    %c19 = arith.constant 19 : index
    %c0_10 = arith.constant 0 : index
    %10 = vector.load %arg4[%c19, %c0_10] : memref<21x128xf32, #tpu.memory_space<vmem>>, vector<1x32xf32>
    %c20 = arith.constant 20 : index
    %c0_11 = arith.constant 0 : index
    %11 = vector.load %arg4[%c20, %c0_11] : memref<21x128xf32, #tpu.memory_space<vmem>>, vector<1x128xf32>
    %c0_12 = arith.constant 0 : index
    %c0_13 = arith.constant 0 : index
    %12 = vector.load %arg2[%c0_12, %c0_13] : memref<32x320xf32, #tpu.memory_space<vmem>>, vector<32x96xf32>
    %c0_14 = arith.constant 0 : index
    %c96 = arith.constant 96 : index
    %13 = vector.load %arg2[%c0_14, %c96] : memref<32x320xf32, #tpu.memory_space<vmem>>, vector<32x32xf32>
    %c0_15 = arith.constant 0 : index
    %c128 = arith.constant 128 : index
    %14 = vector.load %arg2[%c0_15, %c128] : memref<32x320xf32, #tpu.memory_space<vmem>>, vector<32x128xf32>
    %c0_16 = arith.constant 0 : index
    %c256 = arith.constant 256 : index
    %15 = vector.load %arg2[%c0_16, %c256] : memref<32x320xf32, #tpu.memory_space<vmem>>, vector<32x64xf32>
    %c0_17 = arith.constant 0 : index
    %c0_18 = arith.constant 0 : index
    %16 = vector.load %arg0[%c0_17, %c0_18] : memref<10x192xf32, #tpu.memory_space<vmem>>, vector<10x192xf32>
    %c0_19 = arith.constant 0 : index
    %c0_20 = arith.constant 0 : index
    %17 = vector.load %arg1[%c0_19, %c0_20] : memref<192x32xf32, #tpu.memory_space<vmem>>, vector<192x32xf32>
    %cst = arith.constant dense<0.000000e+00> : vector<10x32xf32>
    %18 = tpu.matmul %16, %17, %cst {dimension_numbers = #tpu.dot_dimension_numbers<[1], [0], [0], [1], [0, 0, 1, 1], [], []>} : vector<10x192xf32>, vector<192x32xf32>, vector<10x32xf32> -> vector<10x32xf32>
    %19 = arith.addf %18, %0 : vector<10x32xf32>
    %20 = tpu.iota {dimensions = array<i32: 0>} : vector<10x10xi32>
    %21 = tpu.iota {dimensions = array<i32: 1>} : vector<10x10xi32>
    %c0_i32 = arith.constant 0 : i32
    %22 = vector.broadcast %c0_i32 : i32 to vector<10x10xi32>
    %23 = arith.cmpi sge, %20, %22 : vector<10x10xi32>
    %c5_i32 = arith.constant 5 : i32
    %24 = vector.broadcast %c5_i32 : i32 to vector<10x10xi32>
    %25 = arith.cmpi slt, %20, %24 : vector<10x10xi32>
    %26 = arith.andi %23, %25 : vector<10x10xi1>
    %c0_i32_21 = arith.constant 0 : i32
    %27 = vector.broadcast %c0_i32_21 : i32 to vector<10x10xi32>
    %28 = arith.cmpi sge, %21, %27 : vector<10x10xi32>
    %c5_i32_22 = arith.constant 5 : i32
    %29 = vector.broadcast %c5_i32_22 : i32 to vector<10x10xi32>
    %30 = arith.cmpi slt, %21, %29 : vector<10x10xi32>
    %31 = arith.andi %28, %30 : vector<10x10xi1>
    %32 = arith.andi %26, %31 : vector<10x10xi1>
    %c5_i32_23 = arith.constant 5 : i32
    %33 = vector.broadcast %c5_i32_23 : i32 to vector<10x10xi32>
    %34 = arith.cmpi sge, %20, %33 : vector<10x10xi32>
    %c10_i32 = arith.constant 10 : i32
    %35 = vector.broadcast %c10_i32 : i32 to vector<10x10xi32>
    %36 = arith.cmpi slt, %20, %35 : vector<10x10xi32>
    %37 = arith.andi %34, %36 : vector<10x10xi1>
    %c5_i32_24 = arith.constant 5 : i32
    %38 = vector.broadcast %c5_i32_24 : i32 to vector<10x10xi32>
    %39 = arith.cmpi sge, %21, %38 : vector<10x10xi32>
    %c10_i32_25 = arith.constant 10 : i32
    %40 = vector.broadcast %c10_i32_25 : i32 to vector<10x10xi32>
    %41 = arith.cmpi slt, %21, %40 : vector<10x10xi32>
    %42 = arith.andi %39, %41 : vector<10x10xi1>
    %43 = arith.andi %37, %42 : vector<10x10xi1>
    %44 = arith.ori %32, %43 : vector<10x10xi1>
    %cst_26 = arith.constant 0.000000e+00 : f32
    %cst_27 = arith.constant -1.000000e+30 : f32
    %45 = vector.broadcast %cst_26 : f32 to vector<10x10xf32>
    %46 = vector.broadcast %cst_27 : f32 to vector<10x10xf32>
    %47 = arith.select %44, %45, %46 : vector<10x10xi1>, vector<10x10xf32>
    %48 = tpu.iota {dimensions = array<i32: 1>} : vector<1x32xi32>
    %c0_i32_28 = arith.constant 0 : i32
    %49 = vector.broadcast %c0_i32_28 : i32 to vector<1x32xi32>
    %50 = arith.cmpi sge, %48, %49 : vector<1x32xi32>
    %c16_i32 = arith.constant 16 : i32
    %51 = vector.broadcast %c16_i32 : i32 to vector<1x32xi32>
    %52 = arith.cmpi slt, %48, %51 : vector<1x32xi32>
    %53 = arith.andi %50, %52 : vector<1x32xi1>
    %54 = arith.extui %53 : vector<1x32xi1> to vector<1x32xi32>
    %55 = arith.sitofp %54 : vector<1x32xi32> to vector<1x32xf32>
    %c16_i32_29 = arith.constant 16 : i32
    %56 = vector.broadcast %c16_i32_29 : i32 to vector<1x32xi32>
    %57 = arith.cmpi sge, %48, %56 : vector<1x32xi32>
    %c32_i32 = arith.constant 32 : i32
    %58 = vector.broadcast %c32_i32 : i32 to vector<1x32xi32>
    %59 = arith.cmpi slt, %48, %58 : vector<1x32xi32>
    %60 = arith.andi %57, %59 : vector<1x32xi1>
    %61 = arith.extui %60 : vector<1x32xi1> to vector<1x32xi32>
    %62 = arith.sitofp %61 : vector<1x32xi32> to vector<1x32xf32>
    %cst_30 = arith.constant dense<0.000000e+00> : vector<10xf32>
    %63 = vector.multi_reduction <add>, %19, %cst_30 [1] : vector<10x32xf32> to vector<10xf32>
    %64 = vector.shape_cast %63 : vector<10xf32> to vector<10x1xf32>
    %cst_31 = arith.constant 3.200000e+01 : f32
    %65 = vector.broadcast %cst_31 : f32 to vector<10x1xf32>
    %66 = arith.divf %64, %65 : vector<10x1xf32>
    %67 = vector.broadcast %66 : vector<10x1xf32> to vector<10x32xf32>
    %68 = arith.subf %19, %67 : vector<10x32xf32>
    %69 = arith.mulf %68, %68 : vector<10x32xf32>
    %cst_32 = arith.constant dense<0.000000e+00> : vector<10xf32>
    %70 = vector.multi_reduction <add>, %69, %cst_32 [1] : vector<10x32xf32> to vector<10xf32>
    %71 = vector.shape_cast %70 : vector<10xf32> to vector<10x1xf32>
    %cst_33 = arith.constant 3.200000e+01 : f32
    %72 = vector.broadcast %cst_33 : f32 to vector<10x1xf32>
    %73 = arith.divf %71, %72 : vector<10x1xf32>
    %74 = vector.broadcast %66 : vector<10x1xf32> to vector<10x32xf32>
    %75 = arith.subf %19, %74 : vector<10x32xf32>
    %cst_34 = arith.constant 9.99999974E-6 : f32
    %76 = vector.broadcast %cst_34 : f32 to vector<10x1xf32>
    %77 = arith.addf %73, %76 : vector<10x1xf32>
    %78 = math.rsqrt %77 : vector<10x1xf32>
    %79 = vector.broadcast %78 : vector<10x1xf32> to vector<10x32xf32>
    %80 = arith.mulf %75, %79 : vector<10x32xf32>
    %81 = vector.broadcast %1 : vector<1x32xf32> to vector<10x32xf32>
    %82 = arith.mulf %80, %81 : vector<10x32xf32>
    %83 = vector.broadcast %2 : vector<1x32xf32> to vector<10x32xf32>
    %84 = arith.addf %82, %83 : vector<10x32xf32>
    %cst_35 = arith.constant dense<0.000000e+00> : vector<10x96xf32>
    %85 = tpu.matmul %84, %12, %cst_35 {dimension_numbers = #tpu.dot_dimension_numbers<[1], [0], [0], [1], [0, 0, 1, 1], [], []>} : vector<10x32xf32>, vector<32x96xf32>, vector<10x96xf32> -> vector<10x96xf32>
    %86 = vector.broadcast %3 : vector<1x96xf32> to vector<10x96xf32>
    %87 = arith.addf %85, %86 : vector<10x96xf32>
    %88 = vector.extract_strided_slice %87 {offsets = [0, 0], sizes = [10, 32], strides = [1, 1]} : vector<10x96xf32> to vector<10x32xf32>
    %89 = vector.extract_strided_slice %87 {offsets = [0, 32], sizes = [10, 32], strides = [1, 1]} : vector<10x96xf32> to vector<10x32xf32>
    %90 = vector.extract_strided_slice %87 {offsets = [0, 64], sizes = [10, 32], strides = [1, 1]} : vector<10x96xf32> to vector<10x32xf32>
    %91 = tpu.transpose %89, [1, 0] : vector<10x32xf32> -> vector<32x10xf32>
    %cst_36 = arith.constant 0.000000e+00 : f32
    %92 = vector.broadcast %cst_36 : f32 to vector<10x32xf32>
    %93 = vector.broadcast %55 : vector<1x32xf32> to vector<10x32xf32>
    %94 = arith.mulf %88, %93 : vector<10x32xf32>
    %cst_37 = arith.constant dense<0.000000e+00> : vector<10x10xf32>
    %95 = tpu.matmul %94, %91, %cst_37 {dimension_numbers = #tpu.dot_dimension_numbers<[1], [0], [0], [1], [0, 0, 1, 1], [], []>} : vector<10x32xf32>, vector<32x10xf32>, vector<10x10xf32> -> vector<10x10xf32>
    %96 = arith.addf %95, %47 : vector<10x10xf32>
    %cst_38 = arith.constant dense<0xFF800000> : vector<10xf32>
    %97 = vector.multi_reduction <maximumf>, %96, %cst_38 [1] : vector<10x10xf32> to vector<10xf32>
    %98 = vector.shape_cast %97 : vector<10xf32> to vector<10x1xf32>
    %99 = vector.broadcast %98 : vector<10x1xf32> to vector<10x10xf32>
    %100 = arith.subf %96, %99 : vector<10x10xf32>
    %101 = math.exp %100 : vector<10x10xf32>
    %cst_39 = arith.constant dense<0.000000e+00> : vector<10xf32>
    %102 = vector.multi_reduction <add>, %101, %cst_39 [1] : vector<10x10xf32> to vector<10xf32>
    %103 = vector.shape_cast %102 : vector<10xf32> to vector<10x1xf32>
    %104 = tpu.reciprocal %103 {approx = true} : vector<10x1xf32> -> vector<10x1xf32>
    %105 = vector.broadcast %104 : vector<10x1xf32> to vector<10x10xf32>
    %106 = arith.mulf %101, %105 : vector<10x10xf32>
    %cst_40 = arith.constant dense<0.000000e+00> : vector<10x32xf32>
    %107 = tpu.matmul %106, %90, %cst_40 {dimension_numbers = #tpu.dot_dimension_numbers<[1], [0], [0], [1], [0, 0, 1, 1], [], []>} : vector<10x10xf32>, vector<10x32xf32>, vector<10x32xf32> -> vector<10x32xf32>
    %108 = vector.broadcast %55 : vector<1x32xf32> to vector<10x32xf32>
    %109 = arith.mulf %107, %108 : vector<10x32xf32>
    %110 = arith.addf %92, %109 : vector<10x32xf32>
    %111 = vector.broadcast %62 : vector<1x32xf32> to vector<10x32xf32>
    %112 = arith.mulf %88, %111 : vector<10x32xf32>
    %cst_41 = arith.constant dense<0.000000e+00> : vector<10x10xf32>
    %113 = tpu.matmul %112, %91, %cst_41 {dimension_numbers = #tpu.dot_dimension_numbers<[1], [0], [0], [1], [0, 0, 1, 1], [], []>} : vector<10x32xf32>, vector<32x10xf32>, vector<10x10xf32> -> vector<10x10xf32>
    %114 = arith.addf %113, %47 : vector<10x10xf32>
    %cst_42 = arith.constant dense<0xFF800000> : vector<10xf32>
    %115 = vector.multi_reduction <maximumf>, %114, %cst_42 [1] : vector<10x10xf32> to vector<10xf32>
    %116 = vector.shape_cast %115 : vector<10xf32> to vector<10x1xf32>
    %117 = vector.broadcast %116 : vector<10x1xf32> to vector<10x10xf32>
    %118 = arith.subf %114, %117 : vector<10x10xf32>
    %119 = math.exp %118 : vector<10x10xf32>
    %cst_43 = arith.constant dense<0.000000e+00> : vector<10xf32>
    %120 = vector.multi_reduction <add>, %119, %cst_43 [1] : vector<10x10xf32> to vector<10xf32>
    %121 = vector.shape_cast %120 : vector<10xf32> to vector<10x1xf32>
    %122 = tpu.reciprocal %121 {approx = true} : vector<10x1xf32> -> vector<10x1xf32>
    %123 = vector.broadcast %122 : vector<10x1xf32> to vector<10x10xf32>
    %124 = arith.mulf %119, %123 : vector<10x10xf32>
    %cst_44 = arith.constant dense<0.000000e+00> : vector<10x32xf32>
    %125 = tpu.matmul %124, %90, %cst_44 {dimension_numbers = #tpu.dot_dimension_numbers<[1], [0], [0], [1], [0, 0, 1, 1], [], []>} : vector<10x10xf32>, vector<10x32xf32>, vector<10x32xf32> -> vector<10x32xf32>
    %126 = vector.broadcast %62 : vector<1x32xf32> to vector<10x32xf32>
    %127 = arith.mulf %125, %126 : vector<10x32xf32>
    %128 = arith.addf %110, %127 : vector<10x32xf32>
    %cst_45 = arith.constant dense<0.000000e+00> : vector<10x32xf32>
    %129 = tpu.matmul %128, %13, %cst_45 {dimension_numbers = #tpu.dot_dimension_numbers<[1], [0], [0], [1], [0, 0, 1, 1], [], []>} : vector<10x32xf32>, vector<32x32xf32>, vector<10x32xf32> -> vector<10x32xf32>
    %130 = arith.addf %19, %129 : vector<10x32xf32>
    %131 = vector.broadcast %4 : vector<1x32xf32> to vector<10x32xf32>
    %132 = arith.addf %130, %131 : vector<10x32xf32>
    %cst_46 = arith.constant dense<0.000000e+00> : vector<10xf32>
    %133 = vector.multi_reduction <add>, %132, %cst_46 [1] : vector<10x32xf32> to vector<10xf32>
    %134 = vector.shape_cast %133 : vector<10xf32> to vector<10x1xf32>
    %cst_47 = arith.constant 3.200000e+01 : f32
    %135 = vector.broadcast %cst_47 : f32 to vector<10x1xf32>
    %136 = arith.divf %134, %135 : vector<10x1xf32>
    %137 = vector.broadcast %136 : vector<10x1xf32> to vector<10x32xf32>
    %138 = arith.subf %132, %137 : vector<10x32xf32>
    %139 = arith.mulf %138, %138 : vector<10x32xf32>
    %cst_48 = arith.constant dense<0.000000e+00> : vector<10xf32>
    %140 = vector.multi_reduction <add>, %139, %cst_48 [1] : vector<10x32xf32> to vector<10xf32>
    %141 = vector.shape_cast %140 : vector<10xf32> to vector<10x1xf32>
    %cst_49 = arith.constant 3.200000e+01 : f32
    %142 = vector.broadcast %cst_49 : f32 to vector<10x1xf32>
    %143 = arith.divf %141, %142 : vector<10x1xf32>
    %144 = vector.broadcast %136 : vector<10x1xf32> to vector<10x32xf32>
    %145 = arith.subf %132, %144 : vector<10x32xf32>
    %cst_50 = arith.constant 9.99999974E-6 : f32
    %146 = vector.broadcast %cst_50 : f32 to vector<10x1xf32>
    %147 = arith.addf %143, %146 : vector<10x1xf32>
    %148 = math.rsqrt %147 : vector<10x1xf32>
    %149 = vector.broadcast %148 : vector<10x1xf32> to vector<10x32xf32>
    %150 = arith.mulf %145, %149 : vector<10x32xf32>
    %151 = vector.broadcast %5 : vector<1x32xf32> to vector<10x32xf32>
    %152 = arith.mulf %150, %151 : vector<10x32xf32>
    %153 = vector.broadcast %6 : vector<1x32xf32> to vector<10x32xf32>
    %154 = arith.addf %152, %153 : vector<10x32xf32>
    %cst_51 = arith.constant dense<0.000000e+00> : vector<10x64xf32>
    %155 = tpu.matmul %154, %15, %cst_51 {dimension_numbers = #tpu.dot_dimension_numbers<[1], [0], [0], [1], [0, 0, 1, 1], [], []>} : vector<10x32xf32>, vector<32x64xf32>, vector<10x64xf32> -> vector<10x64xf32>
    %156 = vector.broadcast %7 : vector<1x64xf32> to vector<10x64xf32>
    %157 = arith.addf %155, %156 : vector<10x64xf32>
    %158 = arith.mulf %157, %157 : vector<10x64xf32>
    %159 = arith.mulf %157, %158 : vector<10x64xf32>
    %cst_52 = arith.constant 4.471500e-02 : f32
    %160 = vector.broadcast %cst_52 : f32 to vector<10x64xf32>
    %161 = arith.mulf %160, %159 : vector<10x64xf32>
    %162 = arith.addf %157, %161 : vector<10x64xf32>
    %cst_53 = arith.constant 0.797884583 : f32
    %163 = vector.broadcast %cst_53 : f32 to vector<10x64xf32>
    %164 = arith.mulf %163, %162 : vector<10x64xf32>
    %165 = math.tanh %164 : vector<10x64xf32>
    %cst_54 = arith.constant 1.000000e+00 : f32
    %166 = vector.broadcast %cst_54 : f32 to vector<10x64xf32>
    %167 = arith.addf %166, %165 : vector<10x64xf32>
    %cst_55 = arith.constant 5.000000e-01 : f32
    %168 = vector.broadcast %cst_55 : f32 to vector<10x64xf32>
    %169 = arith.mulf %168, %167 : vector<10x64xf32>
    %170 = arith.mulf %157, %169 : vector<10x64xf32>
    %c0_56 = arith.constant 0 : index
    %c0_57 = arith.constant 0 : index
    %171 = vector.load %arg3[%c0_56, %c0_57] : memref<64x32xf32, #tpu.memory_space<vmem>>, vector<64x32xf32>
    %cst_58 = arith.constant dense<0.000000e+00> : vector<10x32xf32>
    %172 = tpu.matmul %170, %171, %cst_58 {dimension_numbers = #tpu.dot_dimension_numbers<[1], [0], [0], [1], [0, 0, 1, 1], [], []>} : vector<10x64xf32>, vector<64x32xf32>, vector<10x32xf32> -> vector<10x32xf32>
    %173 = vector.broadcast %8 : vector<1x32xf32> to vector<10x32xf32>
    %174 = arith.addf %172, %173 : vector<10x32xf32>
    %175 = arith.addf %132, %174 : vector<10x32xf32>
    %cst_59 = arith.constant dense<0.000000e+00> : vector<10xf32>
    %176 = vector.multi_reduction <add>, %175, %cst_59 [1] : vector<10x32xf32> to vector<10xf32>
    %177 = vector.shape_cast %176 : vector<10xf32> to vector<10x1xf32>
    %cst_60 = arith.constant 3.200000e+01 : f32
    %178 = vector.broadcast %cst_60 : f32 to vector<10x1xf32>
    %179 = arith.divf %177, %178 : vector<10x1xf32>
    %180 = vector.broadcast %179 : vector<10x1xf32> to vector<10x32xf32>
    %181 = arith.subf %175, %180 : vector<10x32xf32>
    %182 = arith.mulf %181, %181 : vector<10x32xf32>
    %cst_61 = arith.constant dense<0.000000e+00> : vector<10xf32>
    %183 = vector.multi_reduction <add>, %182, %cst_61 [1] : vector<10x32xf32> to vector<10xf32>
    %184 = vector.shape_cast %183 : vector<10xf32> to vector<10x1xf32>
    %cst_62 = arith.constant 3.200000e+01 : f32
    %185 = vector.broadcast %cst_62 : f32 to vector<10x1xf32>
    %186 = arith.divf %184, %185 : vector<10x1xf32>
    %187 = vector.broadcast %179 : vector<10x1xf32> to vector<10x32xf32>
    %188 = arith.subf %175, %187 : vector<10x32xf32>
    %cst_63 = arith.constant 9.99999974E-6 : f32
    %189 = vector.broadcast %cst_63 : f32 to vector<10x1xf32>
    %190 = arith.addf %186, %189 : vector<10x1xf32>
    %191 = math.rsqrt %190 : vector<10x1xf32>
    %192 = vector.broadcast %191 : vector<10x1xf32> to vector<10x32xf32>
    %193 = arith.mulf %188, %192 : vector<10x32xf32>
    %194 = vector.broadcast %9 : vector<1x32xf32> to vector<10x32xf32>
    %195 = arith.mulf %193, %194 : vector<10x32xf32>
    %196 = vector.broadcast %10 : vector<1x32xf32> to vector<10x32xf32>
    %197 = arith.addf %195, %196 : vector<10x32xf32>
    %cst_64 = arith.constant dense<0.000000e+00> : vector<10x128xf32>
    %198 = tpu.matmul %197, %14, %cst_64 {dimension_numbers = #tpu.dot_dimension_numbers<[1], [0], [0], [1], [0, 0, 1, 1], [], []>} : vector<10x32xf32>, vector<32x128xf32>, vector<10x128xf32> -> vector<10x128xf32>
    %199 = vector.broadcast %11 : vector<1x128xf32> to vector<10x128xf32>
    %200 = arith.addf %198, %199 : vector<10x128xf32>
    %c0_65 = arith.constant 0 : index
    %c0_66 = arith.constant 0 : index
    %201 = vector.load %arg5[%c0_65, %c0_66] : memref<10x128xf32, #tpu.memory_space<vmem>>, vector<10x128xf32>
    tpu.vector_store %arg5[%c0_65, %c0_66], %200 {strides = array<i32>} : memref<10x128xf32, #tpu.memory_space<vmem>>, vector<10x128xf32>,
    return
  }
}

</mosaic_0001>

<bundles_post_ra>
// kernel: forward.1
= control target key start
LH: loop header
LB: loop body
LE: loop exit
PB: predicated region body
PF: predicated region fallthrough
CT: control target
= control target key end

     0   :  { %vm73_vm0 = vcmask 523264   ;;  %vm166_vm1 = vcmask 261120   ;;  %vm170_vm2 = vcmask 254976   ;;  %v810_v40 = vmov 32.0   ;;  %s811_s15 = smov 96   ;;  %s814_s16 = smov 64   ;;  %s1159_s1 = inlined_call_operand.vmem [shape: f32[192,32], index: 1, kind: input, shape index: {}]   ;;  %s1160_s4 = inlined_call_operand.vmem [shape: f32[21,128], index: 4, kind: input, shape index: {}]   ;;  %s1161_s0 = inlined_call_operand.vmem [shape: f32[10,192], index: 0, kind: input, shape index: {}]   ;;  %s1162_s2 = inlined_call_operand.vmem [shape: f32[32,320], index: 2, kind: input, shape index: {}]   ;;  %s1163_s3 = inlined_call_operand.vmem [shape: f32[64,32], index: 3, kind: input, shape index: {}]   ;;  %s1164_s5 = inlined_call_operand.vmem [shape: f32[10,128], index: 5, kind: output, shape index: {}]  }
   0x1   :  { %v64_v0 = vld [vmem:[%s1159_s1 + $0x78] sm:$0xff]  ;;  %v63_v1 = vld [vmem:[%s1159_s1 + $0x70] sm:$0xff]  ;;  %v62_v2 = vld [vmem:[%s1159_s1 + $0x68] sm:$0xff]  ;;  %776 = vrcp.f32 %v810_v40  ;;  %s815_s17 = smov 32  }
   0x2   :  { %80 = vmatpush.msra.mxu0 %v64_v0  ;;  %v72_v3 = vld [vmem:[%s1159_s1 + $0xb8] sm:$0xff]  ;;  %v61_v4 = vld [vmem:[%s1159_s1 + $0x60] sm:$0xff]  ;;  %v71_v5 = vld [vmem:[%s1159_s1 + $0xb0] sm:$0xff] }
   0x3   :  { %111 = vmatpush.msra.mxu1 %v72_v3  ;;  %v70_v6 = vld [vmem:[%s1159_s1 + $0xa8] sm:$0xff]  ;;  %v60_v7 = vld [vmem:[%s1159_s1 + $0x58] sm:$0xff]  ;;  %v69_v8 = vld [vmem:[%s1159_s1 + $0xa0] sm:$0xff] }
   0x4   :  { %81 = vmatpush.msra.mxu0 %v63_v1  ;;  %v59_v9 = vld [vmem:[%s1159_s1 + $0x50] sm:$0xff]  ;;  %v58_v10 = vld [vmem:[%s1159_s1 + $0x48] sm:$0xff]  ;;  %v68_v11 = vld [vmem:[%s1159_s1 + $0x98] sm:$0xff] }
   0x5   :  { %112 = vmatpush.msra.mxu1 %v71_v5  ;;  %v67_v12 = vld [vmem:[%s1159_s1 + $0x90] sm:$0xff]  ;;  %v57_v13 = vld [vmem:[%s1159_s1 + $0x40] sm:$0xff]  ;;  %v66_v14 = vld [vmem:[%s1159_s1 + $0x88] sm:$0xff] }
   0x6   :  { %82 = vmatpush.msra.mxu0 %v62_v2  ;;  %v56_v15 = vld [vmem:[%s1159_s1 + $0x38] sm:$0xff]  ;;  %v65_v16 = vld [vmem:[%s1159_s1 + $0x80] sm:$0xff]  ;;  %v55_v17 = vld [vmem:[%s1159_s1 + $0x30] sm:$0xff] }
   0x7   :  { %113 = vmatpush.msra.mxu1 %v70_v6  ;;  %v46_v18 = vld [vmem:[%s1161_s0 + $0x8] sm:$0xff]  ;;  %v53_v20 = vld [vmem:[%s1159_s1 + $0x20] sm:$0xff]  ;;  %v52_v21 = vld [vmem:[%s1159_s1 + $0x18] sm:$0xff]  ;;  %v777_v41 = vpop.eup %776 }
   0x8   :  { %83 = vmatpush.msra.mxu0 %v61_v4  ;;  %v54_v19 = vld [vmem:[%s1159_s1 + $0x28] sm:$0xff]  ;;  %v51_v22 = vld [vmem:[%s1159_s1 + $0x10] sm:$0xff]  ;;  %v48_v23 = vld [vmem:[%s1161_s0 + $0x18] sm:$0x3]  ;;  %v175_v42 = vmul.f32 32.0, %v777_v41  ;;  %vm179_vm3 = vweird.f32 %v777_v41 }
   0x9   :  { %114 = vmatpush.msra.mxu1 %v69_v8  ;;  %v50_v24 = vld [vmem:[%s1159_s1 + $0x8] sm:$0xff]  ;;  %v49_v25 = vld [vmem:[%s1159_s1] sm:$0xff]  ;;  %v47_v27 = vld [vmem:[%s1161_s0 + $0x10] sm:$0x3] }
   0xa   :  { %84 = vmatpush.msra.mxu0 %v60_v7  ;;  %v45_v26 = vld [vmem:[%s1161_s0] sm:$0xff]  ;;  %v21_v34 = vld [vmem:[%s1160_s4 + $0x8] sm:$0x3]  ;;  %v176_v43 = vsub.f32 1.0, %v175_v42  ;;  %v963_v58 = vld [vmem:[%s1162_s2 + $0x30] sm:$0xff] }
   0xb   :  { %115 = vmatpush.msra.mxu1 %v68_v11  ;;  %v20_v28 = vld [vmem:[%s1160_s4] sm:$0xff]  ;;  %v957_v57 = vld [vmem:[%s1162_s2 + $0x48] sm:$0xff]  ;;  %v969_v59 = vld [vmem:[%s1162_s2 + $0x18] sm:$0xff] }
   0xc   :  { %85 = vmatpush.msra.mxu0 %v59_v9  ;;  %v177_v44 = vmul.f32 %v777_v41, %v176_v43  ;;  %244 = vmatpush.msra.mxu2 %v957_v57  ;;  %v975_v60 = vld [vmem:[%s1162_s2] sm:$0xff]  ;;  %v755_v61 = vpack.i.bf16 %v963_v58, %v957_v57 }
   0xd   :  { %116 = vmatpush.msra.mxu1 %v67_v12  ;;  %v760_v62 = vpack.i.bf16 %v975_v60, %v969_v59 }
   0xe   :  { %86 = vmatpush.msra.mxu0 %v58_v10  ;;  %v178_v45 = vadd.f32 %v777_v41, %v177_v44  ;;  %245 = vmatpush.msra.mxu2 %v963_v58 }
   0xf   :  { %117 = vmatpush.msra.mxu1 %v66_v14 }
  0x10   :  { %87 = vmatpush.msra.mxu0 %v57_v13  ;;  %v946_v46 = vsel %vm179_vm3, %v777_v41, %v178_v45  ;;  %246 = vmatpush.msra.mxu2 %v969_v59  ;;  %v765_v13 = vld [vmem:[%s1160_s4 + $0xa] ss:$0 sm:$0xff] }
  0x11   :  { %118 = vmatpush.msra.mxu1 %v65_v16 }
  0x12   :  { %88 = vmatpush.msra.mxu0 %v56_v15  ;;  %721 = vmatmul.msk.f32.vlgmr.msra.gmra.mxu1 %vm73_vm0, %v46_v18 }
  0x13   :  { %247 = vmatpush.msra.mxu2 %v975_v60 }
  0x14   :  { %89 = vmatpush.msra.mxu0 %v55_v17  ;;  %v766_v17 = vld [vmem:[%s1160_s4 + $0xb] ss:$0 sm:$0xff] }
  0x16   :  { %90 = vmatpush.msra.mxu0 %v54_v19 }
  0x18   :  { %91 = vmatpush.msra.mxu0 %v53_v20 }
  0x1a   :  { %92 = vmatpush.msra.mxu0 %v52_v21  ;;  %722 = vmatmul.msk.f32.gmra.mxu1 %vm73_vm0, %v48_v23 }
  0x1c   :  { %93 = vmatpush.msra.mxu0 %v51_v22 }
  0x1e   :  { %94 = vmatpush.msra.mxu0 %v50_v24 }
  0x20   :  { %95 = vmatpush.msra.mxu0 %v49_v25 }
  0x21   :  { %96 = vmatmul.f32.vlgmr.msra.gmra.mxu0 %v45_v26 }
  0x29   :  { %99 = vmatmul.f32.gmra.mxu0 %v47_v27 }
  0x8f   :  { %v120_v29 = vpop.f32.mrf.mxu1 }
  0x97   :  { %v123_v36 = vpop.f32.mrf.mxu1 }
  0x9e   :  { %v97_v30 = vpop.f32.mrf.mxu0 }
  0x9f   :  { %v98_v31 = vadd.f32 %v97_v30, %v20_v28  ;;  %v767_v28 = vld [vmem:[%s1160_s4 + $0xc] ss:$0 sm:$0xff] }
  0xa1   :  { %v935_v32 = vadd.f32 %v120_v29, %v98_v31 }
  0xa3   :  { %v167_v33 = vsel %vm166_vm1, %v935_v32, 0.0 }
  0xa4   :  { %168 = vadd.xlane.f32.xlu0 %v167_v33  ;;  %v126_v33 = vlaneseq }
  0xa6   :  { %v100_v35 = vpop.f32.mrf.mxu0  ;;  %v127_v45 = vshrl.u32 %v126_v33, 7 }
  0xa7   :  { %v101_v37 = vadd.f32 %v100_v35, %v21_v34  ;;  %v130_v35 = vand.u32 127, %v126_v33 }
  0xa8   :  { %vm133_vm3 = vcmp.lt.s32.totalorder %v127_v45, 5 }
  0xa9   :  { %v942_v38 = vadd.f32 %v123_v36, %v101_v37  ;;  %vm157_vm10 = vcmp.lt.s32.totalorder %v130_v35, 16  ;;  %v812_v36 = vmov 0.0   ;;  %vm161_vm11 = vcmp.ge.s32.totalorder %v130_v35, 16 }
  0xaa   :  { %v1002_v37 = vsel %vm157_vm10, 1.0, %v812_v36  ;;  %vm162_vm12 = vcmp.lt.s32.totalorder %v130_v35, 32  ;;  %vm148_vm14 = vcmp.ge.s32.totalorder %v130_v35, 5  ;;  %vm149_vm15 = vcmp.lt.s32.totalorder %v130_v35, 10 }
  0xab   :  { %v171_v39 = vsel %vm170_vm2, %v942_v38, 0.0  ;;  %vm163_vm13 = vmand %vm161_vm11, %vm162_vm12  ;;  %vm296_vm10 = vcmask 80896  }
  0xac   :  { %172 = vadd.xlane.f32.xlu0 %v171_v39  ;;  %v1013_v42 = vsel %vm163_vm13, 1.0, %v812_v36  ;;  %vm300_vm13 = vcmask 74752  }
 0x117   :  { %v169_v47 = vpop.xlane.xlu0 %168 }
 0x118   :  { %v181_v48 = vmul.f32 %v946_v46, %v169_v47  ;;  %v128_v47 = vadd.s32 8, %v127_v45 }
 0x11a   :  { %v183_v49 = vsub.f32 %v935_v32, %v181_v48  ;;  %v813_v48 = vmov -1e+30   ;;  %vm145_vm11 = vcmp.lt.s32.totalorder %v128_v47, 10 }
 0x11c   :  { %v185_v50 = vmul.f32 %v183_v49, %v183_v49 }
 0x11e   :  { %v187_v51 = vsel %vm166_vm1, %v185_v50, 0.0 }
 0x11f   :  { %188 = vadd.xlane.f32.xlu1 %v187_v51  ;;  %v173_v52 = vpop.xlane.xlu0 %172 }
 0x120   :  { %v182_v53 = vmul.f32 %v946_v46, %v173_v52 }
 0x122   :  { %v184_v54 = vsub.f32 %v942_v38, %v182_v53 }
 0x124   :  { %v186_v55 = vmul.f32 %v184_v54, %v184_v54 }
 0x126   :  { %v190_v56 = vsel %vm170_vm2, %v186_v55, 0.0 }
 0x127   :  { %191 = vadd.xlane.f32.xlu1 %v190_v56 }
 0x192   :  { %v189_v63 = vpop.xlane.xlu1 %188 }
 0x193   :  { %v193_v0 = vmul.f32 %v189_v63, %v946_v46 }
 0x195   :  { %v195_v1 = vadd.f32 1e-05, %v193_v0 }
 0x197   :  { %778 = vrsqrt.f32 %v195_v1  ;;  %vm203_vm5 = vweird.f32 %v195_v1 }
 0x19a   :  { %v192_v2 = vpop.xlane.xlu1 %191 }
 0x19b   :  { %v194_v3 = vmul.f32 %v192_v2, %v946_v46 }
 0x19d   :  { %v779_v4 = vpop.eup %778  ;;  %v196_v5 = vadd.f32 1e-05, %v194_v3 }
 0x19e   :  { %v198_v6 = vmul.f32 %v779_v4, %v195_v1  ;;  %vm204_vm4 = vweird.f32 %v779_v4 }
 0x19f   :  { %780 = vrsqrt.f32 %v196_v5  ;;  %vm205_vm6 = vmor %vm203_vm5, %vm204_vm4  ;;  %vm213_vm8 = vweird.f32 %v196_v5  ;;  %vm138_vm4 = vcmp.lt.s32.totalorder %v130_v35, 5  ;;  %vm142_vm5 = vcmp.ge.s32.totalorder %v127_v45, 5 }
 0x1a0   :  { %v199_v7 = vmul.f32 %v779_v4, %v198_v6 }
 0x1a2   :  { %v200_v8 = vmul.f32 0.5, %v199_v7 }
 0x1a4   :  { %v201_v9 = vsub.f32 1.5, %v200_v8 }
 0x1a5   :  { %v781_v10 = vpop.eup %780 }
 0x1a6   :  { %v202_v11 = vmul.f32 %v779_v4, %v201_v9  ;;  %v208_v12 = vmul.f32 %v781_v10, %v196_v5  ;;  %vm214_vm7 = vweird.f32 %v781_v10 }
 0x1a7   :  { %vm215_vm9 = vmor %vm213_vm8, %vm214_vm7 }
 0x1a8   :  { %v206_v14 = vsel %vm205_vm6, %v779_v4, %v202_v11  ;;  %v209_v15 = vmul.f32 %v781_v10, %v208_v12  ;;  %vm150_vm6 = vmand %vm148_vm14, %vm149_vm15  ;;  %vm331_vm14 = vcmask 1041408  }
 0x1a9   :  { %v217_v16 = vmul.f32 %v206_v14, %v183_v49  ;;  %vm140_vm7 = vmand %vm133_vm3, %vm138_vm4 }
 0x1aa   :  { %v210_v18 = vmul.f32 0.5, %v209_v15  ;;  %vm151_vm8 = vmand %vm142_vm5, %vm150_vm6 }
 0x1ab   :  { %v220_v19 = vmul.f32 %v765_v13, %v217_v16  ;;  %vm152_vm12 = vmand %vm145_vm11, %vm150_vm6 }
 0x1ac   :  { %v211_v20 = vsub.f32 1.5, %v210_v18  ;;  %v156_v53 = vsel %vm152_vm12, 0.0, %v813_v48 }
 0x1ad   :  { %v223_v21 = vadd.f32 %v766_v17, %v220_v19 }
 0x1ae   :  { %v212_v22 = vmul.f32 %v781_v10, %v211_v20 }
 0x1af   :  { %725 = vmatmul.msk.f32.vlgmr.msra.gmra.mxu2 %vm166_vm1, %v223_v21 }
 0x1b0   :  { %v216_v23 = vsel %vm215_vm9, %v781_v10, %v212_v22  ;;  %vm153_vm9 = vmor %vm140_vm7, %vm151_vm8 }
 0x1b1   :  { %v218_v24 = vmul.f32 %v216_v23, %v184_v54  ;;  %v155_v49 = vsel %vm153_vm9, 0.0, %v813_v48 }
 0x1b3   :  { %v221_v25 = vmul.f32 %v765_v13, %v218_v24 }
 0x1b5   :  { %v224_v26 = vadd.f32 %v766_v17, %v221_v25 }
 0x1b7   :  { %726 = vmatmul.msk.f32.gmra.mxu2 %vm166_vm1, %v224_v26 }
 0x232   :  { %v249_v27 = vpop.f32.mrf.mxu2 }
 0x233   :  { %v998_v31 = vadd.f32 %v767_v28, %v249_v27 }
 0x235   :  { %v255_v40 = vmul.f32 %v1002_v37, %v998_v31  ;;  %v361_v43 = vmul.f32 %v1013_v42, %v998_v31 }
 0x23a   :  { %v252_v29 = vpop.f32.mrf.mxu2 }
 0x23b   :  { %v995_v30 = vadd.f32 %v767_v28, %v252_v29 }
 0x23d   :  { %261 = vrot.lane.b32.xlu2 %v995_v30, %s811_s15  ;;  %v256_v41 = vmul.f32 %v1002_v37, %v995_v30  ;;  %v362_v44 = vmul.f32 %v1013_v42, %v995_v30 }
 0x245   :  { %259 = vrot.lane.b32.xlu2 %v998_v31, %s811_s15 }
 0x297   :  { %v262_v34 = vpop.permute.xlu2 %261 }
 0x298   :  { %727 = vmatpush.xpose.msk.msra.mxu3 %vm166_vm1, %v262_v34 }
 0x29f   :  { %v260_v39 = vpop.permute.xlu2 %259 }
 0x2a0   :  { %728 = vmatpush.xpose.msk.msra.mxu3 %vm166_vm1, %v260_v39 }
 0x2a3   :  { %729 = vmatmul.msk.f32.vlgmr.msra.gmra.mxu3 %vm166_vm1, %v255_v40 }
 0x2a4   :  { %734 = vmatpush.xpose.msk.msrb.mxu3 %vm166_vm1, %v262_v34 }
 0x2a8   :  { %735 = vmatpush.xpose.msk.msrb.mxu3 %vm166_vm1, %v260_v39 }
 0x2ab   :  { %730 = vmatmul.msk.f32.gmra.mxu3 %vm166_vm1, %v256_v41 }
 0x2b3   :  { %736 = vmatmul.msk.f32.vlgmr.msrb.gmra.mxu3 %vm166_vm1, %v361_v43 }
 0x2bb   :  { %737 = vmatmul.msk.f32.gmra.mxu3 %vm166_vm1, %v362_v44 }
 0x326   :  { %v290_v50 = vpop.f32.mrf.mxu3 }
 0x327   :  { %v291_v51 = vadd.f32 %v290_v50, %v155_v49 }
 0x329   :  { %v297_v52 = vsel %vm296_vm10, %v291_v51, -inf }
 0x32a   :  { %298 = vmax.xlane.f32.xlu0 %v297_v52 }
 0x32e   :  { %v293_v54 = vpop.f32.mrf.mxu3 }
 0x32f   :  { %v294_v55 = vadd.f32 %v293_v54, %v156_v53  ;;  %v768_v54 = vld [vmem:[%s1160_s4 + $0xd] ss:$0 sm:$0xff] }
 0x331   :  { %v301_v56 = vsel %vm300_vm13, %v294_v55, -inf }
 0x332   :  { %302 = vmax.xlane.f32.xlu2 %v301_v56 }
 0x336   :  { %v386_v63 = vpop.f32.mrf.mxu3 }
 0x337   :  { %v387_v0 = vadd.f32 %v386_v63, %v155_v49 }
 0x339   :  { %v392_v1 = vsel %vm296_vm10, %v387_v0, -inf }
 0x33a   :  { %393 = vmax.xlane.f32.xlu1 %v392_v1 }
 0x33e   :  { %v389_v2 = vpop.f32.mrf.mxu3 }
 0x33f   :  { %v390_v3 = vadd.f32 %v389_v2, %v156_v53 }
 0x341   :  { %v395_v4 = vsel %vm300_vm13, %v390_v3, -inf }
 0x342   :  { %396 = vmax.xlane.f32.xlu0 %v395_v4 }
 0x34a   :  { %756 = vrot.lane.b32.xlu2 %v755_v61, %s815_s17 }
 0x39d   :  { %v299_v5 = vpop.xlane.xlu0 %298 }
 0x39e   :  { %v304_v6 = vsub.f32 %v291_v51, %v299_v5 }
 0x3a0   :  { %v306_v7 = vmul.f32 1.442695, %v304_v6 }
 0x3a2   :  { %782 = vpow2.f32 %v306_v7 }
 0x3a5   :  { %v303_v8 = vpop.xlane.xlu2 %302 }
 0x3a6   :  { %v305_v9 = vsub.f32 %v294_v55, %v303_v8 }
 0x3a8   :  { %v783_v10 = vpop.eup %782  ;;  %v308_v11 = vmul.f32 1.442695, %v305_v9 }
 0x3a9   :  { %v310_v12 = vsel %vm296_vm10, %v783_v10, 0.0 }
 0x3aa   :  { %784 = vpow2.f32 %v308_v11  ;;  %311 = vadd.xlane.f32.xlu1 %v310_v12  ;;  %v44_v11 = vld [vmem:[%s1162_s2 + $0x58] sm:$0xff]  ;;  %v43_v12 = vld [vmem:[%s1162_s2 + $0x40] sm:$0xff] }
 0x3ab   :  { %566 = vmatpush.msra.mxu3 %v44_v11 }
 0x3ad   :  { %v394_v13 = vpop.xlane.xlu1 %393  ;;  %v757_v34 = vpop.permute.xlu2 %756  ;;  %567 = vmatpush.msra.mxu3 %v43_v12 }
 0x3ae   :  { %v398_v14 = vsub.f32 %v387_v0, %v394_v13  ;;  %v759_v36 = vunpack.i.h.bf16 %v757_v34  ;;  %v758_v39 = vunpack.i.l.bf16 %v757_v34  ;;  %v42_v13 = vld [vmem:[%s1162_s2 + $0x28] sm:$0xff] }
 0x3af   :  { %568 = vmatpush.msra.mxu3 %v42_v13  ;;  %v772_v13 = vld [vmem:[%s1160_s4 + $0x11] ss:$0 sm:$0xff] }
 0x3b0   :  { %v785_v15 = vpop.eup %784  ;;  %v400_v16 = vmul.f32 1.442695, %v398_v14  ;;  %v41_v14 = vld [vmem:[%s1162_s2 + $0x10] sm:$0xff] }
 0x3b1   :  { %v313_v17 = vsel %vm300_vm13, %v785_v15, 0.0  ;;  %569 = vmatpush.msra.mxu3 %v41_v14 }
 0x3b2   :  { %786 = vpow2.f32 %v400_v16  ;;  %314 = vadd.xlane.f32.xlu0 %v313_v17 }
 0x3b5   :  { %v397_v20 = vpop.xlane.xlu0 %396 }
 0x3b6   :  { %v399_v21 = vsub.f32 %v390_v3, %v397_v20 }
 0x3b8   :  { %v787_v18 = vpop.eup %786  ;;  %v402_v22 = vmul.f32 1.442695, %v399_v21 }
 0x3b9   :  { %v404_v19 = vsel %vm296_vm10, %v787_v18, 0.0 }
 0x3ba   :  { %405 = vadd.xlane.f32.xlu0 %v404_v19  ;;  %788 = vpow2.f32 %v402_v22 }
 0x3c0   :  { %v789_v23 = vpop.eup %788 }
 0x3c1   :  { %v407_v24 = vsel %vm300_vm13, %v789_v23, 0.0 }
 0x3c3   :  { %322 = vrot.lane.b32.xlu1 %v995_v30, %s814_s16 }
 0x3ce   :  { %320 = vrot.lane.b32.xlu0 %v998_v31, %s814_s16 }
 0x3d6   :  { %761 = vrot.lane.b32.xlu0 %v760_v62, %s815_s17 }
 0x3ed   :  { %408 = vadd.xlane.f32.xlu1 %v407_v24  ;;  %v769_v24 = vld [vmem:[%s1160_s4 + $0xe] ss:$0 sm:$0xff] }
 0x41d   :  { %v312_v26 = vpop.xlane.xlu1 %311 }
 0x41e   :  { %790 = vrcp.f32 %v312_v26 }
 0x424   :  { %v791_v58 = vpop.eup %790 }
 0x425   :  { %v315_v25 = vpop.xlane.xlu0 %314  ;;  %v318_v61 = vmul.f32 %v791_v58, %v783_v10 }
 0x42d   :  { %v406_v27 = vpop.xlane.xlu0 %405 }
 0x42e   :  { %792 = vrcp.f32 %v406_v27  ;;  %v770_v27 = vld [vmem:[%s1160_s4 + $0xf] ss:$0 sm:$0xff] }
 0x42f   :  { %794 = vrcp.f32 %v315_v25 }
 0x434   :  { %v793_v59 = vpop.eup %792 }
 0x435   :  { %v323_v57 = vpop.permute.xlu1 %322  ;;  %v412_v62 = vmul.f32 %v793_v59, %v787_v18  ;;  %v795_v28 = vpop.eup %794 }
 0x436   :  { %731 = vmatpush.msk.msrb.mxu2 %vm331_vm14, %v323_v57  ;;  %738 = vmatpush.msk.msrb.mxu1 %vm331_vm14, %v323_v57  ;;  %v319_v29 = vmul.f32 %v795_v28, %v785_v15 }
 0x440   :  { %v321_v60 = vpop.permute.xlu0 %320 }
 0x441   :  { %349 = vmatpush.msrb.mxu2 %v321_v60  ;;  %435 = vmatpush.msrb.mxu1 %v321_v60 }
 0x442   :  { %732 = vmatmul.msk.f32.vlgmr.msrb.gmra.mxu2 %vm296_vm10, %v318_v61  ;;  %739 = vmatmul.msk.f32.vlgmr.msrb.gmra.mxu1 %vm296_vm10, %v412_v62 }
 0x443   :  { %481 = vmatpush.msra.mxu2 %v758_v39 }
 0x445   :  { %482 = vmatpush.msra.mxu2 %v759_v36 }
 0x448   :  { %v762_v35 = vpop.permute.xlu0 %761 }
 0x449   :  { %v763_v40 = vunpack.i.l.bf16 %v762_v35  ;;  %v764_v41 = vunpack.i.h.bf16 %v762_v35 }
 0x44a   :  { %733 = vmatmul.msk.f32.gmra.mxu2 %vm296_vm10, %v319_v29 }
 0x44b   :  { %483 = vmatpush.msra.mxu2 %v763_v40  ;;  %v602_v40 = vld [vmem:[%s1163_s3 + $0x38] sm:$0xff] }
 0x44c   :  { %618 = vmatpush.msrb.mxu0 %v602_v40  ;;  %v773_v40 = vld [vmem:[%s1160_s4 + $0x12] ss:$0 sm:$0xff] }
 0x44d   :  { %484 = vmatpush.msra.mxu2 %v764_v41  ;;  %v601_v41 = vld [vmem:[%s1163_s3 + $0x30] sm:$0xff] }
 0x44e   :  { %619 = vmatpush.msrb.mxu0 %v601_v41 }
 0x460   :  { %v409_v30 = vpop.xlane.xlu1 %408 }
 0x461   :  { %796 = vrcp.f32 %v409_v30 }
 0x467   :  { %v797_v31 = vpop.eup %796 }
 0x468   :  { %v413_v33 = vmul.f32 %v797_v31, %v789_v23 }
 0x46a   :  { %740 = vmatmul.msk.f32.gmra.mxu1 %vm296_vm10, %v413_v33 }
 0x4bf   :  { %v437_v43 = vpop.f32.mrf.mxu1 }
 0x4c0   :  { %v443_v45 = vmul.f32 %v1013_v42, %v437_v43  ;;  %v600_v43 = vld [vmem:[%s1163_s3 + $0x28] sm:$0xff] }
 0x4c1   :  { %620 = vmatpush.msrb.mxu0 %v600_v43 }
 0x4c5   :  { %v351_v44 = vpop.f32.mrf.mxu2 }
 0x4c6   :  { %v357_v47 = vmul.f32 %v1002_v37, %v351_v44  ;;  %v599_v44 = vld [vmem:[%s1163_s3 + $0x20] sm:$0xff] }
 0x4c7   :  { %621 = vmatpush.msrb.mxu0 %v599_v44  ;;  %v774_v44 = vld [vmem:[%s1160_s4 + $0x13] ss:$0 sm:$0xff] }
 0x4c8   :  { %v445_v48 = vadd.f32 %v443_v45, %v357_v47  ;;  %v598_v45 = vld [vmem:[%s1163_s3 + $0x18] sm:$0xff]  ;;  %v597_v47 = vld [vmem:[%s1163_s3 + $0x10] sm:$0xff] }
 0x4c9   :  { %622 = vmatpush.msrb.mxu0 %v598_v45 }
 0x4ca   :  { %741 = vmatmul.msk.f32.vlgmr.msra.gmra.mxu2 %vm166_vm1, %v445_v48  ;;  %v596_v48 = vld [vmem:[%s1163_s3 + $0x8] sm:$0xff] }
 0x4cb   :  { %623 = vmatpush.msrb.mxu0 %v597_v47 }
 0x4cd   :  { %v354_v49 = vpop.f32.mrf.mxu2  ;;  %624 = vmatpush.msrb.mxu0 %v596_v48 }
 0x4ce   :  { %v358_v51 = vmul.f32 %v1002_v37, %v354_v49  ;;  %v595_v49 = vld [vmem:[%s1163_s3] sm:$0xff] }
 0x4cf   :  { %625 = vmatpush.msrb.mxu0 %v595_v49 }
 0x4e7   :  { %v440_v50 = vpop.f32.mrf.mxu1 }
 0x4e8   :  { %v444_v52 = vmul.f32 %v1013_v42, %v440_v50  ;;  %v771_v50 = vld [vmem:[%s1160_s4 + $0x10] ss:$0 sm:$0xff] }
 0x4ea   :  { %v446_v53 = vadd.f32 %v444_v52, %v358_v51 }
 0x4ec   :  { %742 = vmatmul.msk.f32.gmra.mxu2 %vm166_vm1, %v446_v53 }
 0x54d   :  { %v486_v55 = vpop.f32.mrf.mxu2 }
 0x54e   :  { %v492_v56 = vadd.f32 %v486_v55, %v935_v32 }
 0x550   :  { %v1051_v63 = vadd.f32 %v768_v54, %v492_v56 }
 0x552   :  { %v497_v0 = vsel %vm166_vm1, %v1051_v63, 0.0 }
 0x553   :  { %498 = vadd.xlane.f32.xlu0 %v497_v0 }
 0x56f   :  { %v489_v1 = vpop.f32.mrf.mxu2 }
 0x570   :  { %v493_v37 = vadd.f32 %v489_v1, %v942_v38 }
 0x572   :  { %v1056_v42 = vadd.f32 %v768_v54, %v493_v37 }
 0x574   :  { %v500_v2 = vsel %vm170_vm2, %v1056_v42, 0.0 }
 0x575   :  { %501 = vadd.xlane.f32.xlu2 %v500_v2 }
 0x5c6   :  { %v499_v3 = vpop.xlane.xlu0 %498 }
 0x5c7   :  { %v503_v4 = vmul.f32 %v499_v3, %v946_v46 }
 0x5c9   :  { %v505_v32 = vsub.f32 %v1051_v63, %v503_v4 }
 0x5cb   :  { %v507_v5 = vmul.f32 %v505_v32, %v505_v32 }
 0x5cd   :  { %v509_v6 = vsel %vm166_vm1, %v507_v5, 0.0 }
 0x5ce   :  { %510 = vadd.xlane.f32.xlu1 %v509_v6 }
 0x5e8   :  { %v502_v7 = vpop.xlane.xlu2 %501 }
 0x5e9   :  { %v504_v8 = vmul.f32 %v502_v7, %v946_v46 }
 0x5eb   :  { %v506_v38 = vsub.f32 %v1056_v42, %v504_v8 }
 0x5ed   :  { %v508_v9 = vmul.f32 %v506_v38, %v506_v38 }
 0x5ef   :  { %v512_v10 = vsel %vm170_vm2, %v508_v9, 0.0 }
 0x5f0   :  { %513 = vadd.xlane.f32.xlu1 %v512_v10 }
 0x641   :  { %v511_v15 = vpop.xlane.xlu1 %510 }
 0x642   :  { %v515_v16 = vmul.f32 %v511_v15, %v946_v46 }
 0x644   :  { %v517_v17 = vadd.f32 1e-05, %v515_v16 }
 0x646   :  { %798 = vrsqrt.f32 %v517_v17  ;;  %vm525_vm3 = vweird.f32 %v517_v17 }
 0x64c   :  { %v799_v18 = vpop.eup %798 }
 0x64d   :  { %v520_v19 = vmul.f32 %v799_v18, %v517_v17  ;;  %vm526_vm15 = vweird.f32 %v799_v18 }
 0x64e   :  { %vm527_vm4 = vmor %vm525_vm3, %vm526_vm15 }
 0x64f   :  { %v521_v20 = vmul.f32 %v799_v18, %v520_v19 }
 0x651   :  { %v522_v21 = vmul.f32 0.5, %v521_v20 }
 0x653   :  { %v523_v22 = vsub.f32 1.5, %v522_v21 }
 0x655   :  { %v524_v23 = vmul.f32 %v799_v18, %v523_v22 }
 0x657   :  { %v528_v25 = vsel %vm527_vm4, %v799_v18, %v524_v23 }
 0x658   :  { %v539_v26 = vmul.f32 %v528_v25, %v505_v32 }
 0x65a   :  { %v542_v57 = vmul.f32 %v769_v24, %v539_v26 }
 0x65c   :  { %v545_v58 = vadd.f32 %v770_v27, %v542_v57 }
 0x65e   :  { %743 = vmatmul.msk.f32.vlgmr.msra.gmra.mxu3 %vm166_vm1, %v545_v58 }
 0x663   :  { %v514_v59 = vpop.xlane.xlu1 %513 }
 0x664   :  { %v516_v60 = vmul.f32 %v514_v59, %v946_v46 }
 0x666   :  { %v518_v61 = vadd.f32 1e-05, %v516_v60  ;;  %v39_v60 = vld [vmem:[%s1162_s2 + $0x38] sm:$0xff] }
 0x668   :  { %800 = vrsqrt.f32 %v518_v61  ;;  %vm535_vm6 = vweird.f32 %v518_v61 }
 0x66e   :  { %v801_v62 = vpop.eup %800 }
 0x66f   :  { %v530_v28 = vmul.f32 %v801_v62, %v518_v61  ;;  %vm536_vm5 = vweird.f32 %v801_v62  ;;  %v38_v61 = vld [vmem:[%s1162_s2 + $0x20] sm:$0xff] }
 0x670   :  { %vm537_vm7 = vmor %vm535_vm6, %vm536_vm5 }
 0x671   :  { %v531_v29 = vmul.f32 %v801_v62, %v530_v28 }
 0x673   :  { %v532_v30 = vmul.f32 0.5, %v531_v29 }
 0x675   :  { %v533_v31 = vsub.f32 1.5, %v532_v30 }
 0x677   :  { %v534_v33 = vmul.f32 %v801_v62, %v533_v31 }
 0x679   :  { %v538_v34 = vsel %vm537_vm7, %v801_v62, %v534_v33  ;;  %v37_v62 = vld [vmem:[%s1162_s2 + $0x8] sm:$0xff] }
 0x67a   :  { %v540_v35 = vmul.f32 %v538_v34, %v506_v38 }
 0x67c   :  { %v543_v36 = vmul.f32 %v769_v24, %v540_v35 }
 0x67e   :  { %v546_v39 = vadd.f32 %v770_v27, %v543_v36 }
 0x680   :  { %744 = vmatmul.msk.f32.gmra.mxu3 %vm166_vm1, %v546_v39 }
 0x6e1   :  { %v571_v51 = vpop.f32.mrf.mxu3 }
 0x6e2   :  { %v572_v52 = vadd.f32 %v771_v50, %v571_v51 }
 0x6e4   :  { %v577_v53 = vmul.f32 %v572_v52, %v572_v52 }
 0x6e6   :  { %v579_v54 = vmul.f32 %v577_v53, %v572_v52 }
 0x6e8   :  { %v581_v55 = vmul.f32 0.044715, %v579_v54 }
 0x6ea   :  { %v583_v56 = vadd.f32 %v581_v55, %v572_v52 }
 0x6ec   :  { %v585_v0 = vmul.f32 0.7978846, %v583_v56 }
 0x6ee   :  { %802 = vtanh.f32 %v585_v0 }
 0x6f4   :  { %v803_v1 = vpop.eup %802 }
 0x6f5   :  { %v589_v37 = vadd.f32 1.0, %v803_v1 }
 0x6f7   :  { %v591_v2 = vmul.f32 0.5, %v589_v37 }
 0x6f9   :  { %v593_v3 = vmul.f32 %v591_v2, %v572_v52 }
 0x6fb   :  { %745 = vmatmul.msk.f32.vlgmr.msrb.gmra.mxu0 %vm73_vm0, %v593_v3 }
 0x703   :  { %v574_v4 = vpop.f32.mrf.mxu3 }
 0x704   :  { %v575_v32 = vadd.f32 %v771_v50, %v574_v4 }
 0x706   :  { %v578_v5 = vmul.f32 %v575_v32, %v575_v32 }
 0x708   :  { %v580_v6 = vmul.f32 %v578_v5, %v575_v32 }
 0x70a   :  { %v582_v7 = vmul.f32 0.044715, %v580_v6 }
 0x70c   :  { %v584_v8 = vadd.f32 %v582_v7, %v575_v32 }
 0x70e   :  { %v586_v38 = vmul.f32 0.7978846, %v584_v8 }
 0x710   :  { %804 = vtanh.f32 %v586_v38 }
 0x716   :  { %v805_v9 = vpop.eup %804 }
 0x717   :  { %v590_v10 = vadd.f32 1.0, %v805_v9 }
 0x719   :  { %v592_v11 = vmul.f32 0.5, %v590_v10 }
 0x71b   :  { %v594_v12 = vmul.f32 %v592_v11, %v575_v32 }
 0x71d   :  { %746 = vmatmul.msk.f32.gmra.mxu0 %vm73_vm0, %v594_v12 }
 0x778   :  { %v627_v14 = vpop.f32.mrf.mxu0 }
 0x779   :  { %v628_v15 = vadd.f32 %v772_v13, %v627_v14 }
 0x77b   :  { %v633_v16 = vadd.f32 %v628_v15, %v1051_v63 }
 0x77d   :  { %v635_v17 = vsel %vm166_vm1, %v633_v16, 0.0 }
 0x77e   :  { %636 = vadd.xlane.f32.xlu1 %v635_v17 }
 0x79a   :  { %v630_v18 = vpop.f32.mrf.mxu0 }
 0x79b   :  { %v631_v19 = vadd.f32 %v772_v13, %v630_v18 }
 0x79d   :  { %v634_v20 = vadd.f32 %v631_v19, %v1056_v42  ;;  %v40_v42 = vld [vmem:[%s1162_s2 + $0x50] sm:$0xff] }
 0x79e   :  { %704 = vmatpush.msra.mxu1 %v40_v42 }
 0x79f   :  { %v638_v21 = vsel %vm170_vm2, %v634_v20, 0.0 }
 0x7a0   :  { %639 = vadd.xlane.f32.xlu0 %v638_v21  ;;  %705 = vmatpush.msra.mxu1 %v39_v60 }
 0x7a2   :  { %706 = vmatpush.msra.mxu1 %v38_v61 }
 0x7a4   :  { %707 = vmatpush.msra.mxu1 %v37_v62 }
 0x7f1   :  { %v637_v22 = vpop.xlane.xlu1 %636 }
 0x7f2   :  { %v641_v23 = vmul.f32 %v637_v22, %v946_v46 }
 0x7f4   :  { %v643_v24 = vsub.f32 %v633_v16, %v641_v23 }
 0x7f6   :  { %v645_v25 = vmul.f32 %v643_v24, %v643_v24 }
 0x7f8   :  { %v647_v26 = vsel %vm166_vm1, %v645_v25, 0.0 }
 0x7f9   :  { %648 = vadd.xlane.f32.xlu2 %v647_v26 }
 0x813   :  { %v640_v27 = vpop.xlane.xlu0 %639 }
 0x814   :  { %v642_v63 = vmul.f32 %v640_v27, %v946_v46 }
 0x816   :  { %v644_v57 = vsub.f32 %v634_v20, %v642_v63 }
 0x818   :  { %v646_v58 = vmul.f32 %v644_v57, %v644_v57 }
 0x81a   :  { %v650_v59 = vsel %vm170_vm2, %v646_v58, 0.0 }
 0x81b   :  { %651 = vadd.xlane.f32.xlu1 %v650_v59 }
 0x86c   :  { %v649_v28 = vpop.xlane.xlu2 %648 }
 0x86d   :  { %v653_v29 = vmul.f32 %v649_v28, %v946_v46 }
 0x86f   :  { %v655_v30 = vadd.f32 1e-05, %v653_v29 }
 0x871   :  { %806 = vrsqrt.f32 %v655_v30  ;;  %vm663_vm2 = vweird.f32 %v655_v30 }
 0x877   :  { %v807_v31 = vpop.eup %806 }
 0x878   :  { %v658_v33 = vmul.f32 %v807_v31, %v655_v30  ;;  %vm664_vm0 = vweird.f32 %v807_v31 }
 0x879   :  { %vm665_vm8 = vmor %vm663_vm2, %vm664_vm0 }
 0x87a   :  { %v659_v34 = vmul.f32 %v807_v31, %v658_v33 }
 0x87c   :  { %v660_v35 = vmul.f32 0.5, %v659_v34 }
 0x87e   :  { %v661_v36 = vsub.f32 1.5, %v660_v35 }
 0x880   :  { %v662_v39 = vmul.f32 %v807_v31, %v661_v36 }
 0x882   :  { %v666_v41 = vsel %vm665_vm8, %v807_v31, %v662_v39 }
 0x883   :  { %v677_v43 = vmul.f32 %v666_v41, %v643_v24 }
 0x885   :  { %v680_v45 = vmul.f32 %v773_v40, %v677_v43 }
 0x887   :  { %v683_v47 = vadd.f32 %v774_v44, %v680_v45 }
 0x889   :  { %747 = vmatmul.msk.f32.vlgmr.msra.gmra.mxu1 %vm166_vm1, %v683_v47 }
 0x88e   :  { %v652_v48 = vpop.xlane.xlu1 %651 }
 0x88f   :  { %v654_v49 = vmul.f32 %v652_v48, %v946_v46  ;;  %v775_v46 = vld [vmem:[%s1160_s4 + $0x14] ss:$0 sm:$0xff] }
 0x891   :  { %v656_v50 = vadd.f32 1e-05, %v654_v49 }
 0x893   :  { %808 = vrsqrt.f32 %v656_v50  ;;  %vm673_vm10 = vweird.f32 %v656_v50 }
 0x899   :  { %v809_v51 = vpop.eup %808 }
 0x89a   :  { %v668_v52 = vmul.f32 %v809_v51, %v656_v50  ;;  %vm674_vm9 = vweird.f32 %v809_v51 }
 0x89b   :  { %vm675_vm11 = vmor %vm673_vm10, %vm674_vm9 }
 0x89c   :  { %v669_v53 = vmul.f32 %v809_v51, %v668_v52 }
 0x89e   :  { %v670_v54 = vmul.f32 0.5, %v669_v53 }
 0x8a0   :  { %v671_v55 = vsub.f32 1.5, %v670_v54 }
 0x8a2   :  { %v672_v56 = vmul.f32 %v809_v51, %v671_v55 }
 0x8a4   :  { %v676_v0 = vsel %vm675_vm11, %v809_v51, %v672_v56 }
 0x8a5   :  { %v678_v1 = vmul.f32 %v676_v0, %v644_v57 }
 0x8a7   :  { %v681_v37 = vmul.f32 %v773_v40, %v678_v1 }
 0x8a9   :  { %v684_v2 = vadd.f32 %v774_v44, %v681_v37 }
 0x8ab   :  { %748 = vmatmul.msk.f32.gmra.mxu1 %vm166_vm1, %v684_v2 }
 0x906   :  { %v709_v3 = vpop.f32.mrf.mxu1 }
 0x907   :  { %v710_v4 = vadd.f32 %v775_v46, %v709_v3 }
 0x909   :  { %715 = vst [vmem:[%s1164_s5] sm:$0xff] %v710_v4 }
 0x928   :  { %v712_v32 = vpop.f32.mrf.mxu1 }
 0x929   :  { %v713_v5 = vadd.f32 %v775_v46, %v712_v32 }
 0x92b   :  { %716 = vst [vmem:[%s1164_s5 + $0x8] sm:$0x3] %v713_v5 }

</bundles_post_ra>
